<compile_context>
chip_gen: v5e
topology: v5e:2x2
jax: 0.10.0
libtpu: 0.0.40
codegen_flags: <defaults>
</compile_context>

<pallas_src>
import functools

import jax
import jax.numpy as jnp
from jax import lax
from jax.experimental import pallas as pl
from jax.experimental.pallas import tpu as pltpu

_LANE = 128          # lane-dense last dim of every tile
_MAX_TR = 8192       # row tile cap: 8192 * 128 * 4B = 4 MiB per f32 tile buffer


# ---------------------------------------------------------------------------
# Kernels (grid = (batch, row-tiles, sampled-position); last axis "arbitrary")
# ---------------------------------------------------------------------------

def _pool_kernel_direct(x_ref, o_ref, *, num, mode):
    """'max' (any dtype) / 'avg' (f32): accumulate directly into the resident
    output block, no scratch.  x_ref: (1,1,TR,128), o_ref: (1,TR,128)."""
    s = pl.program_id(2)
    v = x_ref[0, 0]

    if mode == "max":
        @pl.when(s == 0)
        def _():
            o_ref[0] = v

        @pl.when(s > 0)
        def _():
            o_ref[0] = jnp.maximum(o_ref[0], v)

    else:  # 'avg' with f32 output
        inv = 1.0 / float(num)
        if num == 1:
            o_ref[0] = v
        else:
            @pl.when(s == 0)
            def _():
                o_ref[0] = v

            @pl.when(jnp.logical_and(s > 0, s < num - 1))
            def _():
                o_ref[0] = o_ref[0] + v

            @pl.when(s == num - 1)
            def _():
                o_ref[0] = (o_ref[0] + v) * inv


def _pool_kernel_scratch(x_ref, o_ref, acc_ref, *, num, mode):
    """'avg'/'max' with a non-f32 output dtype: one f32 accumulator."""
    s = pl.program_id(2)
    v = x_ref[0, 0].astype(jnp.float32)

    @pl.when(s == 0)
    def _():
        acc_ref[...] = v

    @pl.when(s > 0)
    def _():
        if mode == "avg":
            acc_ref[...] = acc_ref[...] + v
        else:
            acc_ref[...] = jnp.maximum(acc_ref[...], v)

    @pl.when(s == num - 1)
    def _():
        r = acc_ref[...]
        if mode == "avg":
            r = r * (1.0 / float(num))
        o_ref[0] = r.astype(o_ref.dtype)


def _pool_kernel_weighted(x_ref, o_ref, acc_ref, m_ref, l_ref, *, num):
    """Softmax-weighted sum over the sampled-position axis (online softmax,
    one exponential per step)."""
    s = pl.program_id(2)
    v = x_ref[0, 0].astype(jnp.float32)

    @pl.when(s == 0)
    def _():
        m_ref[...] = v
        l_ref[...] = jnp.ones_like(l_ref)   # exp(v - v) = 1
        acc_ref[...] = v                    # v * exp(v - v)

    @pl.when(s > 0)
    def _():
        m_old = m_ref[...]
        # m_new = max(m_old, v); one of exp(m_old - m_new) / exp(v - m_new)
        # is exp(0) = 1, so a single EUP exp suffices.
        t = jnp.exp(-jnp.abs(m_old - v))
        new_is_max = v > m_old
        a = jnp.where(new_is_max, t, jnp.float32(1.0))   # exp(m_old - m_new)
        e = jnp.where(new_is_max, jnp.float32(1.0), t)   # exp(v     - m_new)
        l_ref[...] = a * l_ref[...] + e
        acc_ref[...] = a * acc_ref[...] + v * e
        m_ref[...] = jnp.maximum(m_old, v)

    @pl.when(s == num - 1)
    def _():
        # Exact divide (off the critical path) for parity with F.softmax.
        o_ref[0] = (acc_ref[...] / l_ref[...]).astype(o_ref.dtype)


# ---------------------------------------------------------------------------
# Host-side wrapper
# ---------------------------------------------------------------------------

def _chip_config():
    """Chip-aware VMEM budget (v7x has only 64 MiB VMEM per TensorCore)."""
    vmem_cap = 128 * 1024 * 1024
    try:
        info = pltpu.get_tpu_info()
        vmem_cap = int(getattr(info, "vmem_capacity_bytes", vmem_cap))
    except Exception:
        pass
    if vmem_cap <= 64 * 1024 * 1024:            # v7x-class
        return 48 * 1024 * 1024
    return 64 * 1024 * 1024                     # v5e / v6e (128 MiB physical)


def _gather_sampled(x, sample_ind, kh, kw, stride, oh, ow):
    """Gather only the sampled kernel positions: (b, num, c, L)."""
    b, c, h, w = x.shape
    L = oh * ow
    hh = stride * (oh - 1) + 1
    ww = stride * (ow - 1) + 1

    def one(xb, p):  # xb: (c, h, w), p: scalar int32 kernel-position index
        ki = p // kw
        kj = p % kw
        zero = jnp.zeros((), dtype=p.dtype)
        sl = lax.dynamic_slice(xb, (zero, ki, kj), (c, hh, ww))
        return sl[:, ::stride, ::stride].reshape(c, L)

    return jax.vmap(lambda xb, ps: jax.vmap(lambda p: one(xb, p))(ps))(x, sample_ind)


def random_pooling_2d(x, sample_ind, *, kernel_size=(2, 2), stride=2, mode="avg"):
    """x: (b, c, h, w) NCHW.  sample_ind: (b, num) int32 kernel-position indices."""
    b, c, h, w = x.shape
    kh, kw = kernel_size
    oh = (h - kh) // stride + 1
    ow = (w - kw) // stride + 1
    L = oh * ow
    num = sample_ind.shape[1]

    # Gather only the `num` sampled positions per batch: (b, num, c, L).
    xg = _gather_sampled(x, sample_ind, kh, kw, stride, oh, ow)

    # Lane-dense layout: flatten (c, L) -> N and view as (rows, 128) tiles.
    N = c * L
    rows = pl.cdiv(N, _LANE)
    align = 16 if jnp.dtype(x.dtype).itemsize == 2 else 8

    if rows <= _MAX_TR:
        tr = rows                 # full dim (no divisibility constraint)
        rows_pad = rows
    else:
        n_tiles = pl.cdiv(rows, _MAX_TR)
        tr = ((pl.cdiv(rows, n_tiles) + align - 1) // align) * align
        rows_pad = n_tiles * tr

    # Keep >= 2 blocks on the parallel axes (both v7x TensorCores busy).
    if b * (rows_pad // tr) < 2 and rows >= 2 * align:
        tr = ((pl.cdiv(rows, 2) + align - 1) // align) * align
        rows_pad = 2 * tr

    n_pad = rows_pad * _LANE
    xg_flat = xg.reshape(b, num, N)
    if n_pad != N:
        xg_flat = jnp.pad(xg_flat, ((0, 0), (0, 0), (0, n_pad - N)))
    xg_tiled = xg_flat.reshape(b, num, rows_pad, _LANE)

    # Per-mode kernel / scratch.
    if mode == "weighted":
        kernel = functools.partial(_pool_kernel_weighted, num=num)
        scratch = [pltpu.VMEM((tr, _LANE), jnp.float32)] * 3
    elif mode == "max" or (mode == "avg" and x.dtype == jnp.float32):
        kernel = functools.partial(_pool_kernel_direct, num=num, mode=mode)
        scratch = []
    elif mode == "avg":
        kernel = functools.partial(_pool_kernel_scratch, num=num, mode=mode)
        scratch = [pltpu.VMEM((tr, _LANE), jnp.float32)]
    else:
        raise ValueError(f"unknown mode {mode}")

    grid = (b, rows_pad // tr, num)

    out = pl.pallas_call(
        kernel,
        out_shape=jax.ShapeDtypeStruct((b, rows_pad, _LANE), x.dtype),
        grid_spec=pltpu.PrefetchScalarGridSpec(
            num_scalar_prefetch=0,
            grid=grid,
            in_specs=[
                pl.BlockSpec((1, 1, tr, _LANE), lambda i, l, s: (i, s, l, 0)),
            ],
            out_specs=pl.BlockSpec((1, tr, _LANE), lambda i, l, s: (i, l, 0)),
            scratch_shapes=scratch,
        ),
        compiler_params=pltpu.CompilerParams(
            dimension_semantics=("parallel", "parallel", "arbitrary"),
            vmem_limit_bytes=_chip_config(),
        ),
    )(xg_tiled)

    return out.reshape(b, n_pad)[:, :N].reshape(b, c, oh, ow)


# ---------------------------------------------------------------------------
# Pure-JAX reference (intended semantics) + test harness
# ---------------------------------------------------------------------------

def _reference(x, sample_ind, *, kernel_size=(2, 2), stride=2, mode="avg"):
    b, c, h, w = x.shape
    kh, kw = kernel_size
    oh = (h - kh) // stride + 1
    ow = (w - kw) // stride + 1
    L = oh * ow
    patches = []
    for ki in range(kh):
        for kj in range(kw):
            sl = x[:, :,
                   ki:ki + stride * (oh - 1) + 1:stride,
                   kj:kj + stride * (ow - 1) + 1:stride]
            patches.append(sl.reshape(b, c, L))
    xu = jnp.stack(patches, axis=2)                      # (b, c, K, L)
    idx = sample_ind[:, None, :, None]                   # (b, 1, num, 1)
    idx = jnp.broadcast_to(idx, (b, c, sample_ind.shape[1], L))
    g = jnp.take_along_axis(xu, idx, axis=2)             # (b, c, num, L)
    if mode == "avg":
        r = jnp.mean(g, axis=2)
    elif mode == "max":
        r = jnp.max(g, axis=2)
    else:
        s = jax.nn.softmax(g, axis=2)
        r = jnp.sum(g * s, axis=2)
    return r.reshape(b, c, oh, ow)


if __name__ == "__main__":
    key = jax.random.PRNGKey(0)
    kx, ks = jax.random.split(key)

    configs = [
        dict(num=2, kernel_size=(2, 2), stride=2, mode="avg"),
        dict(num=3, kernel_size=(2, 2), stride=2, mode="max"),
        dict(num=2, kernel_size=(3, 3), stride=1, mode="weighted"),
    ]

    b, c, h, w = 2, 4, 16, 16
    for cfg in configs:
        kh, kw = cfg["kernel_size"]
        K = kh * kw
        num = cfg["num"]
        kx, k1 = jax.random.split(kx)
        ks, k2 = jax.random.split(ks)

        x = jax.random.normal(k1, (b, c, h, w), dtype=jnp.float32)

        # torch.multinomial(ones(K), num) per batch: uniform sampling w/o replacement.
        sub = jax.random.split(k2, b)
        sample_ind = jnp.stack(
            [jax.random.choice(k, K, shape=(num,), replace=False) for k in sub]
        ).astype(jnp.int32)                               # (b, num)

        out = random_pooling_2d(x, sample_ind, kernel_size=cfg["kernel_size"],
                                stride=cfg["stride"], mode=cfg["mode"])
        out = jax.block_until_ready(out)

        ref = _reference(x, sample_ind, kernel_size=cfg["kernel_size"],
                         stride=cfg["stride"], mode=cfg["mode"])
        oh = (h - kh) // cfg["stride"] + 1
        ow = (w - kw) // cfg["stride"] + 1
        assert out.shape == (b, c, oh, ow), cfg
        tol = 1e-4 if cfg["mode"] == "weighted" else 1e-5
        assert jnp.allclose(out, ref, atol=tol, rtol=tol), cfg

    print("KERNEL_OK")
</pallas_src>

<mosaic_0001>
module attributes {stable_mosaic.version = 11 : i64} {
  func.func @_pool_kernel_direct(%arg0: i32, %arg1: i32, %arg2: i32, %arg3: memref<1x1x2x128xf32, #tpu.memory_space<vmem>>, %arg4: memref<1x2x128xf32, #tpu.memory_space<vmem>>) attributes {dimension_semantics = [#tpu.dimension_semantics<parallel>, #tpu.dimension_semantics<parallel>, #tpu.dimension_semantics<arbitrary>], iteration_bounds = array<i64: 2, 1, 2>, scalar_prefetch = 0 : i64, scratch_operands = 0 : i64, tpu.core_type = #tpu.core_type<tc>, window_params = [{transform_indices = @transform_0, window_bounds = array<i64: 1, 1, 2, 128>}, {transform_indices = @transform_1, window_bounds = array<i64: 1, 2, 128>}]} {
    %c0 = arith.constant 0 : index
    %c0_0 = arith.constant 0 : index
    %c0_1 = arith.constant 0 : index
    %c0_2 = arith.constant 0 : index
    %0 = vector.load %arg3[%c0, %c0_0, %c0_1, %c0_2] : memref<1x1x2x128xf32, #tpu.memory_space<vmem>>, vector<1x1x2x128xf32>
    %1 = vector.shape_cast %0 : vector<1x1x2x128xf32> to vector<2x128xf32>
    %c0_i32 = arith.constant 0 : i32
    %2 = arith.cmpi eq, %arg2, %c0_i32 : i32
    %3 = arith.extui %2 : i1 to i32
    %c0_i32_3 = arith.constant 0 : i32
    %4 = arith.cmpi ne, %3, %c0_i32_3 : i32
    scf.if %4 {
      %c0_8 = arith.constant 0 : index
      %c0_9 = arith.constant 0 : index
      %c0_10 = arith.constant 0 : index
      %13 = vector.load %arg4[%c0_8, %c0_9, %c0_10] : memref<1x2x128xf32, #tpu.memory_space<vmem>>, vector<1x2x128xf32>
      %14 = vector.shape_cast %13 : vector<1x2x128xf32> to vector<2x128xf32>
      %15 = vector.shape_cast %1 : vector<2x128xf32> to vector<1x2x128xf32>
      tpu.vector_store %arg4[%c0_8, %c0_9, %c0_10], %15 {strides = array<i32>} : memref<1x2x128xf32, #tpu.memory_space<vmem>>, vector<1x2x128xf32>,
    } else {
    }
    %c0_i32_4 = arith.constant 0 : i32
    %5 = arith.cmpi sgt, %arg2, %c0_i32_4 : i32
    %c1_i32 = arith.constant 1 : i32
    %6 = arith.cmpi slt, %arg2, %c1_i32 : i32
    %7 = arith.andi %5, %6 : i1
    %8 = arith.extui %7 : i1 to i32
    %c0_i32_5 = arith.constant 0 : i32
    %9 = arith.cmpi ne, %8, %c0_i32_5 : i32
    scf.if %9 {
      %c0_8 = arith.constant 0 : index
      %c0_9 = arith.constant 0 : index
      %c0_10 = arith.constant 0 : index
      %13 = vector.load %arg4[%c0_8, %c0_9, %c0_10] : memref<1x2x128xf32, #tpu.memory_space<vmem>>, vector<1x2x128xf32>
      %14 = vector.shape_cast %13 : vector<1x2x128xf32> to vector<2x128xf32>
      %15 = arith.addf %14, %1 : vector<2x128xf32>
      %c0_11 = arith.constant 0 : index
      %c0_12 = arith.constant 0 : index
      %c0_13 = arith.constant 0 : index
      %16 = vector.load %arg4[%c0_11, %c0_12, %c0_13] : memref<1x2x128xf32, #tpu.memory_space<vmem>>, vector<1x2x128xf32>
      %17 = vector.shape_cast %16 : vector<1x2x128xf32> to vector<2x128xf32>
      %18 = vector.shape_cast %15 : vector<2x128xf32> to vector<1x2x128xf32>
      tpu.vector_store %arg4[%c0_11, %c0_12, %c0_13], %18 {strides = array<i32>} : memref<1x2x128xf32, #tpu.memory_space<vmem>>, vector<1x2x128xf32>,
    } else {
    }
    %c1_i32_6 = arith.constant 1 : i32
    %10 = arith.cmpi eq, %arg2, %c1_i32_6 : i32
    %11 = arith.extui %10 : i1 to i32
    %c0_i32_7 = arith.constant 0 : i32
    %12 = arith.cmpi ne, %11, %c0_i32_7 : i32
    scf.if %12 {
      %c0_8 = arith.constant 0 : index
      %c0_9 = arith.constant 0 : index
      %c0_10 = arith.constant 0 : index
      %13 = vector.load %arg4[%c0_8, %c0_9, %c0_10] : memref<1x2x128xf32, #tpu.memory_space<vmem>>, vector<1x2x128xf32>
      %14 = vector.shape_cast %13 : vector<1x2x128xf32> to vector<2x128xf32>
      %15 = arith.addf %14, %1 : vector<2x128xf32>
      %cst = arith.constant 5.000000e-01 : f32
      %16 = vector.broadcast %cst : f32 to vector<2x128xf32>
      %17 = arith.mulf %15, %16 : vector<2x128xf32>
      %c0_11 = arith.constant 0 : index
      %c0_12 = arith.constant 0 : index
      %c0_13 = arith.constant 0 : index
      %18 = vector.load %arg4[%c0_11, %c0_12, %c0_13] : memref<1x2x128xf32, #tpu.memory_space<vmem>>, vector<1x2x128xf32>
      %19 = vector.shape_cast %18 : vector<1x2x128xf32> to vector<2x128xf32>
      %20 = vector.shape_cast %17 : vector<2x128xf32> to vector<1x2x128xf32>
      tpu.vector_store %arg4[%c0_11, %c0_12, %c0_13], %20 {strides = array<i32>} : memref<1x2x128xf32, #tpu.memory_space<vmem>>, vector<1x2x128xf32>,
    } else {
    }
    return
  }
  func.func @transform_0(%arg0: i32, %arg1: i32, %arg2: i32) -> (i32, i32, i32, i32) {
    %c0_i32 = arith.constant 0 : i32
    %c0_i32_0 = arith.constant 0 : i32
    return %arg0, %arg2, %arg1, %c0_i32 : i32, i32, i32, i32
  }
  func.func @transform_1(%arg0: i32, %arg1: i32, %arg2: i32) -> (i32, i32, i32) {
    %c0_i32 = arith.constant 0 : i32
    %c0_i32_0 = arith.constant 0 : i32
    return %arg0, %arg1, %c0_i32 : i32, i32, i32
  }
}

</mosaic_0001>

<bundles_post_ra>
// kernel: tpu_custom_call.1
= control target key start
LH: loop header
LB: loop body
LE: loop exit
PB: predicated region body
PF: predicated region fallthrough
CT: control target
= control target key end

     0   :  { %6 = vsyncpa [#allocation3], 0  ;;  %s742_s0 = inlined_call_operand.hbm [shape: f32[2,2,2,128], index: 0, kind: input, shape index: {}]   ;;  %s743_s1 = inlined_call_operand.hbm [shape: f32[2,2,128], index: 1, kind: output, shape index: {}]  }
   0x1   :  { %8 = vsyncpa [#allocation3 + $0x1], 0 }
   0x2   :  { %9 = vsyncpa [#allocation4], 0 }
   0x3   :  { %11 = vsyncpa [#allocation4 + $0x1], 0  ;;  %s572_s6 = smov 0   ;;  %s574_s7 = smov 0  }
   0x4   :  { %s576_s8 = smov 0   ;;  %s578_s9 = smov 0  }
   0x5   :  { %s580_s10 = smov 0   ;;  %s582_s11 = smov 0  }
   0x6   :  { %s584_s12 = smov 0   ;;  %s586_s13 = smov 0  }
   0x7   :  { %s588_s14 = smov 0   ;;  %s590_s15 = smov 0  }
   0x8   :  { %s592_s16 = smov 0  }
   0x9 LB: > { %s290_s17 = sadd.s32 4294967295, %s560_s16   ;;  %s291_s18 = sadd.s32 4294967294, %s560_s16   ;;  %s560_s16 = sphi %s592_s16, %s17_s16   ;;  %s556_s15 = sphi %s590_s15, %s760_s15   ;;  %s552_s14 = sphi %s588_s14, %s759_s14   ;;  %s548_s13 = sphi %s586_s13, %s758_s13   ;;  %s544_s12 = sphi %s584_s12, %s757_s12   ;;  %s540_s11 = sphi %s582_s11, %s756_s11   ;;  %s536_s10 = sphi %s580_s10, %s755_s10   ;;  %s532_s9 = sphi %s578_s9, %s754_s9   ;;  %s528_s8 = sphi %s576_s8, %s753_s8   ;;  %s524_s7 = sphi %s574_s7, %s752_s7   ;;  %s520_s6 = sphi %s572_s6, %s751_s6  }
   0xa   : > { %s29_s19 = sadd.s32 1, %s552_s14  ;;  %s36_s20 = sadd.s32 1, %s556_s15 }
   0xb   : > { %p30_p0 = scmp.ge.s32.totalorder %s29_s19, 2  ;;  %s47_s21 = sadd.s32 1, %s540_s11 }
   0xc   : > { %p54_p1 = scmp.ne.s32.totalorder %s540_s11, %s536_s10  ;;  %p55_p2 = scmp.eq.s32.totalorder %s560_s16, 0 }
   0xd   : > { %s762_s19 = smov (%p30_p0, %s29_s19), 0  ;;  %s764_s20 = smov (!%p30_p0, %s36_s20), %s556_s15 }
   0xe   : > { %s41_s22 = ssub.s32 %s552_s14, %s762_s19  ;;  %p638_p3 = por %p55_p2, %p54_p1 }
   0xf   : > { %p38_p4 = scmp.ge.s32.totalorder %s764_s20, 2  ;;  %p60_p5 = scmp.ne.s32.totalorder %s536_s10, %s532_s9 }
  0x10   : > { %p61_p6 = scmp.eq.s32.totalorder %s290_s17, 0  ;;  %s75_s24 = sadd.s32 1, %s528_s8 }
  0x11   : > { %s766_s20 = smov (%p38_p4, %s764_s20), 0  ;;  %p85_p8 = scmp.ne.s32.totalorder %s528_s8, %s524_s7 }
  0x12   : > { %746 = sst [smem:[#allocation8_spill]] %s766_s20  ;;  %p646_p7 = por %p61_p6, %p60_p5 }
  0x13   : > { %s40_s26 = ssub.s32 %s556_s15, %s766_s20  ;;  %p86_p9 = scmp.eq.s32.totalorder %s290_s17, 3 }
  0x14   : > { %s42_s27 = sor.u32 %s41_s22, %s40_s26  ;;  %p73_p10 = scmp.eq.s32.totalorder %s40_s26, 0 }
  0x15   : > { %p45_p11 = scmp.eq.s32.totalorder %s42_s27, 0  ;;  %p654_p12 = por %p86_p9, %p85_p8 }
  0x16   : > { %s659_s29 = scalar_select %p73_p10, %s528_s8, %s75_s24  }
  0x17   : > { %s662_s30 = scalar_select %p45_p11, %s540_s11, %s47_s21  }
  0x18   : > { %p91_p13 = scmp.ne.s32.totalorder %s524_s7, %s520_s6  ;;  %p92_p0 = scmp.eq.s32.totalorder %s291_s18, 3 }
  0x19   : > { %p318_p1 = scmp.lt.s32.totalorder %s560_s16, 4  ;;  %s112_s3 = sand.u32 1, %s540_s11  }
  0x1a   : > { %p667_p2 = por %p92_p0, %p91_p13  ;;  %s294_s4 = sshll.u32 %s112_s3, 1 }
  0x1b   : > { %s295_s5 = sshll.u32 %s556_s15, 1  ;;  %s116_s17 = scalar_lea.vmem [#allocation2], %s294_s4 }
  0x1c   : > { %s121_s9 = sadd.s32 %s552_s14, %s295_s5  ;;  %s127_s22 = sshll.u32 %s116_s17, 4  ;;  %s128_s22 = int_to_ptr.vmem [resolvable:$true] %s127_s22 }
  0x1d   : > { %s296_s26 = sshll.u32 %s121_s9, 1  ;;  %p311_p4 = pnand %p318_p1, %p638_p3 }
  0x1e   : > { %s123_s27 = scalar_lea.hbm %s742_s0, %s296_s26  ;;  %p297_p5 = scmp.ge.s32.totalorder %s560_s16, 1 }
  0x1f   : > { %s125_s18 = sshll.u32 %s123_s27, 4  ;;  %s113_s20 = scalar_lea.sflag [#allocation3], %s112_s3  ;;  %s126_s18 = int_to_ptr.hbm [resolvable:$true] %s125_s18 }
  0x20   : > { %313 = dma.hbm_to_vmem [thread:$0]  (!%p311_p4), %s126_s18, 32, %s128_s22, %s113_s20  }
  0x21   : > { %p132_p6 = scmp.lt.s32.totalorder %s560_s16, 5 }
  0x23   : > { %p133_p8 = pnand %p297_p5, %p132_p6 }
  0x24   : > { %s138_s4 = sand.u32 (!%p133_p8), 1, %s536_s10  }
  0x25   : > { %136 = sbr.rel (%p133_p8) target bundleno = 92 (0x5c), region = 24  ;;  %s298_s5 = sshll.u32 (!%p133_p8), %s138_s4, 1 }
  0x26   : > { %s139_s9 = scalar_lea.sflag (!%p133_p8), [#allocation3], %s138_s4  ;;  %s142_s17 = scalar_lea.vmem (!%p133_p8), [#allocation2], %s298_s5 }
  0x2a   : > { %511 = dma.done.wait (%p646_p7), %s139_s9, 32  }
  0x2b   : > { %513 = vsyncadd (%p646_p7), %s139_s9, 4294967264  ;;  %s159_s23 = sand.u32 1, %s524_s7   ;;  %v162_v0 = vld [vmem:[%s142_s17] sm:$0x3]  ;;  %p300_p3 = scmp.ne.s32.totalorder %s544_s12, 0 }
  0x2c   : > { %s299_s26 = sshll.u32 %s159_s23, 1 }
  0x2d   : > { %s161_s3 = scalar_lea.vmem [#allocation5], %s299_s26  ;;  %166 = sbr.rel (%p300_p3) target bundleno = 51 (0x33), region = 32 }
  0x32   : > { %167 = vst [vmem:[%s161_s3] sm:$0x3] %v162_v0 }
  0x33 PF: > { %p168_p9 = scmp.gt.s32.totalorder %s544_s12, 0  ;;  %p169_p10 = scmp.lt.s32.totalorder %s544_s12, 1 }
  0x35   : > { %p170_p11 = pnand %p169_p10, %p168_p9 }
  0x37   : > { %173 = sbr.rel (%p170_p11) target bundleno = 64 (0x40), region = 36 }
  0x3c   : > { %v174_v1 = vld [vmem:[%s161_s3] sm:$0x3] }
  0x3d   : > { %v175_v2 = vadd.f32 %v174_v1, %v162_v0 }
  0x3f   : > { %176 = vst [vmem:[%s161_s3] sm:$0x3] %v175_v2 }
  0x40 PF: > { %p301_p7 = scmp.ne.s32.totalorder %s544_s12, 1 }
  0x42   : > { %180 = sbr.rel (%p301_p7) target bundleno = 77 (0x4d), region = 40 }
  0x47   : > { %v181_v3 = vld [vmem:[%s161_s3] sm:$0x3] }
  0x48   : > { %v182_v4 = vadd.f32 %v181_v3, %v162_v0 }
  0x4a   : > { %v183_v5 = vmul.f32 0.5, %v182_v4 }
  0x4c   : > { %184 = vst [vmem:[%s161_s3] sm:$0x3] %v183_v5 }
  0x4d PF: > { %s303_s20 = sshll.u32 %s548_s13, 1  ;;  %s199_s21 = sshll.u32 %s161_s3, 4  ;;  %s200_s21 = int_to_ptr.vmem [resolvable:$true] %s199_s21 }
  0x4e   : > { %s197_s24 = scalar_lea.hbm %s743_s1, %s303_s20  ;;  %s186_s18 = scalar_lea.sflag [#allocation4], %s159_s23 }
  0x4f   : > { %s201_s27 = sshll.u32 %s197_s24, 4  ;;  %s458_s13 = scalar_lea.hbm %s743_s1, 4  ;;  %s202_s27 = int_to_ptr.hbm [resolvable:$true] %s201_s27 }
  0x50   : > { %s452_s4 = sshra.s32 %s202_s27, 4  ;;  %s453_s4 = int_to_ptr.hbm [resolvable:$true] %s452_s4 }
  0x51   : > { %s454_s12 = scalar_lea.hbm %s453_s4, 2  ;;  %p459_p4 = scmp.lt.s32.totalorder %s453_s4, %s743_s1 }
  0x52   : > { %p455_p13 = scmp.ne.s32.totalorder %s453_s4, %s454_s12  ;;  %p460_p5 = scmp.lt.s32.totalorder %s458_s13, %s454_s12 }
  0x54   : > { %p456_p0 = pnand %p455_p13, %p654_p12  ;;  %p461_p6 = por %p460_p5, %p459_p4 }
  0x56   : > { %p457_p1 = pneg %p456_p0 }
  0x58   : > { %p462_p8 = pnand %p461_p6, %p457_p1 }
  0x5a   : > { %465 = shalt.err (!%p462_p8)
}
  0x5b   : > { %308 = dma.vmem_to_hbm [thread:$0]  (%p654_p12), %s200_s21, 32, %s202_s27, %s186_s18  }
  0x5c PF: > { %p319_p3 = scmp.ge.s32.totalorder %s560_s16, 2  ;;  %s213_s23 = sand.u32 1, %s520_s6  }
  0x5d   : > { %s214_s3 = scalar_lea.sflag [#allocation4], %s213_s23 }
  0x5e   : > { %p315_p9 = pnand %p319_p3, %p667_p2 }
  0x60   : > { %p316_p10 = pneg %p315_p9 }
  0x62   : > { %515 = dma.done.wait (%p316_p10), %s214_s3, 32  }
  0x63   : > { %517 = vsyncadd (%p316_p10), %s214_s3, 4294967264  ;;  %s17_s16 = sadd.s32 1, %s560_s16   ;;  %s750_s28 = sld [smem:[#allocation8_spill]] }
  0x64   : > { %p14_p11 = scmp.ge.s32.totalorder %s17_s16, 6   ;;  %s751_s6 = smov %s524_s7 }
  0x65   : > { %s752_s7 = smov %s528_s8  ;;  %s753_s8 = smov %s659_s29 }
  0x66   : > { %s754_s9 = smov %s536_s10  ;;  %s755_s10 = smov %s540_s11 }
  0x67   : > { %s756_s11 = smov %s662_s30  ;;  %s757_s12 = smov %s552_s14 }
  0x68   : > { %s758_s13 = smov %s556_s15  ;;  %s759_s14 = smov %s762_s19 }
  0x69   : > { %s760_s15 = smov %s750_s28  ;;  %16 = sbr.rel (!%p14_p11) target bundleno = 9 (0x9), region = 81 }
  0x6e   :  { %220 = vsyncpa [#allocation3], 1 }
  0x6f   :  { %222 = vsyncpa [#allocation3 + $0x1], 1 }
  0x70   :  { %223 = vsyncpa [#allocation4], 1 }
  0x71   :  { %225 = vsyncpa [#allocation4 + $0x1], 1 }

</bundles_post_ra>
